<compile_context>
chip_gen: v7x
topology: tpu7x:2x2x1
jax: 0.10.0
libtpu: 0.0.40
codegen_flags: <defaults>
</compile_context>

<pallas_src>
import jax
import jax.numpy as jnp
from jax.experimental import pallas as pl
from jax.experimental.pallas import tpu as pltpu

D_IN = 512
D_HID = 512
D_OUT = 10
D_OUT_PAD = 128     # lane-dense padded logits width (multiple of 128)
MAX_TILE_B = 512    # max batch rows per grid step (keeps grid >= 2 on v7x for B > 512)


def _label_predictor_kernel(h_ref, w1_ref, b1_ref, w2_ref, b2_ref,
                            w3_ref, b3_ref, o_ref):
    """Fused MLP: 3 bf16 MXU matmuls (f32 accumulate) + bias adds + 2 ReLUs."""
    x = h_ref[...].astype(jnp.bfloat16)               # (tile_b, 512) f32 -> bf16

    z1 = jnp.dot(x, w1_ref[...],
                 preferred_element_type=jnp.float32) + b1_ref[...]
    a1 = jnp.maximum(z1, 0.0).astype(jnp.bfloat16)

    z2 = jnp.dot(a1, w2_ref[...],
                 preferred_element_type=jnp.float32) + b2_ref[...]
    a2 = jnp.maximum(z2, 0.0).astype(jnp.bfloat16)

    z3 = jnp.dot(a2, w3_ref[...],
                 preferred_element_type=jnp.float32) + b3_ref[...]
    o_ref[...] = z3.astype(o_ref.dtype)                # (tile_b, 128) f32


def prepare_params(w1, b1, w2, b2, w3, b3):
    """One-time parameter preprocessing.

    Call once when the model is loaded/updated, NOT per forward pass:
    bf16 weight casts + zero-padding of the final layer to 128 output lanes.
    Padded logit columns are exactly zero and are sliced off by the wrapper.
    """
    w1p = jnp.asarray(w1, jnp.bfloat16)                                   # (512, 512)
    w2p = jnp.asarray(w2, jnp.bfloat16)                                   # (512, 512)
    w3p = jnp.pad(jnp.asarray(w3, jnp.float32),
                  ((0, 0), (0, D_OUT_PAD - w3.shape[1]))).astype(jnp.bfloat16)  # (512, 128)
    b1p = jnp.asarray(b1, jnp.float32).reshape(1, D_HID)
    b2p = jnp.asarray(b2, jnp.float32).reshape(1, D_HID)
    b3p = jnp.pad(jnp.asarray(b3, jnp.float32).reshape(1, D_OUT),
                  ((0, 0), (0, D_OUT_PAD - D_OUT)))
    return (w1p, b1p, w2p, b2p, w3p, b3p)


def _pick_tile_b(batch):
    """Largest tile <= MAX_TILE_B that is a multiple of 8 and covers small batches."""
    rounded = -(-batch // 8) * 8
    return min(MAX_TILE_B, rounded)


@jax.jit
def label_predictor(h, params):
    """h: (B, 512) float32, params from prepare_params() -> logits (B, 10) f32."""
    w1, b1, w2, b2, w3, b3 = params
    B = h.shape[0]
    tile_b = _pick_tile_b(B)
    grid = (pl.cdiv(B, tile_b),)   # ragged last tile handled by Pallas partial blocks

    out = pl.pallas_call(
        _label_predictor_kernel,
        out_shape=jax.ShapeDtypeStruct((B, D_OUT_PAD), jnp.float32),
        grid=grid,
        in_specs=[
            pl.BlockSpec((tile_b, D_IN), lambda i: (i, 0)),      # h: tiled over batch (f32)
            pl.BlockSpec((D_IN, D_HID), lambda i: (0, 0)),       # w1: VMEM-resident
            pl.BlockSpec((1, D_HID), lambda i: (0, 0)),          # b1
            pl.BlockSpec((D_HID, D_HID), lambda i: (0, 0)),      # w2
            pl.BlockSpec((1, D_HID), lambda i: (0, 0)),          # b2
            pl.BlockSpec((D_HID, D_OUT_PAD), lambda i: (0, 0)),  # w3 (128-lane padded)
            pl.BlockSpec((1, D_OUT_PAD), lambda i: (0, 0)),      # b3 (128-lane padded)
        ],
        out_specs=pl.BlockSpec((tile_b, D_OUT_PAD), lambda i: (i, 0)),
        compiler_params=pltpu.CompilerParams(
            dimension_semantics=("parallel",),
        ),
    )(h.astype(jnp.float32), w1, b1, w2, b2, w3, b3)

    return out[:, :D_OUT]


def _init_linear(key, fan_in, fan_out):
    """Deterministic init mimicking PyTorch's default kaiming-uniform ranges."""
    k_w, k_b = jax.random.split(key)
    bound_w = (1.0 / fan_in) ** 0.5 * (3.0 ** 0.5)  # kaiming_uniform(a=sqrt(5))
    bound_b = (1.0 / fan_in) ** 0.5
    # Stored as (in, out) == W_pt.T
    w = jax.random.uniform(k_w, (fan_in, fan_out), jnp.float32, -bound_w, bound_w)
    b = jax.random.uniform(k_b, (1, fan_out), jnp.float32, -bound_b, bound_b)
    return w, b


def _reference_bf16(h, w1, b1, w2, b2, w3, b3):
    """Same numerics as the kernel (bf16 operands, f32 accumulation)."""
    x = h.astype(jnp.bfloat16)
    z1 = jnp.dot(x, w1.astype(jnp.bfloat16),
                 preferred_element_type=jnp.float32) + b1
    a1 = jnp.maximum(z1, 0.0).astype(jnp.bfloat16)
    z2 = jnp.dot(a1, w2.astype(jnp.bfloat16),
                 preferred_element_type=jnp.float32) + b2
    a2 = jnp.maximum(z2, 0.0).astype(jnp.bfloat16)
    return jnp.dot(a2, w3.astype(jnp.bfloat16),
                   preferred_element_type=jnp.float32) + b3


def _reference_f32(h, w1, b1, w2, b2, w3, b3):
    a1 = jnp.maximum(h @ w1 + b1, 0.0)
    a2 = jnp.maximum(a1 @ w2 + b2, 0.0)
    return a2 @ w3 + b3


if __name__ == "__main__":
    key = jax.random.PRNGKey(0)
    k_h, k1, k2, k3 = jax.random.split(key, 4)

    B, D = 8, 512  # small batch; feature dim 512 is fixed by the module
    h = jax.random.normal(k_h, (B, D), jnp.float32)

    w1, b1 = _init_linear(k1, 512, 512)
    w2, b2 = _init_linear(k2, 512, 512)
    w3, b3 = _init_linear(k3, 512, 10)

    # One-time weight preprocessing (hoisted out of the per-call path).
    params = prepare_params(w1, b1, w2, b2, w3, b3)
    params = jax.block_until_ready(params)

    out = label_predictor(h, params)
    out = jax.block_until_ready(out)
    assert out.shape == (B, 10), out.shape

    # Tight check vs a reference with identical (bf16-operand) numerics.
    ref_bf = _reference_bf16(h, w1, b1, w2, b2, w3, b3)
    assert jnp.allclose(out, ref_bf, atol=1e-2, rtol=1e-2), float(
        jnp.max(jnp.abs(out - ref_bf)))

    # Loose sanity check vs the original f32 module semantics.
    ref_f32 = _reference_f32(h, w1, b1, w2, b2, w3, b3)
    assert jnp.allclose(out, ref_f32, atol=1e-1, rtol=1e-1), float(
        jnp.max(jnp.abs(out - ref_f32)))

    print("KERNEL_OK")
</pallas_src>

<mosaic_0001>
module attributes {stable_mosaic.version = 11 : i64} {
  func.func @_label_predictor_kernel(%arg0: i32, %arg1: memref<8x512xf32, #tpu.memory_space<vmem>>, %arg2: memref<512x512xbf16, #tpu.memory_space<vmem>>, %arg3: memref<1x512xf32, #tpu.memory_space<vmem>>, %arg4: memref<512x512xbf16, #tpu.memory_space<vmem>>, %arg5: memref<1x512xf32, #tpu.memory_space<vmem>>, %arg6: memref<512x128xbf16, #tpu.memory_space<vmem>>, %arg7: memref<1x128xf32, #tpu.memory_space<vmem>>, %arg8: memref<8x128xf32, #tpu.memory_space<vmem>>) attributes {dimension_semantics = [#tpu.dimension_semantics<parallel>], iteration_bounds = array<i64: 1>, scalar_prefetch = 0 : i64, scratch_operands = 0 : i64, tpu.core_type = #tpu.core_type<tc>, window_params = [{transform_indices = @transform_0, window_bounds = array<i64: 8, 512>}, {pipeline_mode = #tpu.pipeline_mode<synchronous>, transform_indices = @transform_1, window_bounds = array<i64: 512, 512>}, {pipeline_mode = #tpu.pipeline_mode<synchronous>, transform_indices = @transform_2, window_bounds = array<i64: 1, 512>}, {pipeline_mode = #tpu.pipeline_mode<synchronous>, transform_indices = @transform_3, window_bounds = array<i64: 512, 512>}, {pipeline_mode = #tpu.pipeline_mode<synchronous>, transform_indices = @transform_4, window_bounds = array<i64: 1, 512>}, {pipeline_mode = #tpu.pipeline_mode<synchronous>, transform_indices = @transform_5, window_bounds = array<i64: 512, 128>}, {pipeline_mode = #tpu.pipeline_mode<synchronous>, transform_indices = @transform_6, window_bounds = array<i64: 1, 128>}, {transform_indices = @transform_7, window_bounds = array<i64: 8, 128>}]} {
    %c0 = arith.constant 0 : index
    %c0_0 = arith.constant 0 : index
    %0 = vector.load %arg1[%c0, %c0_0] : memref<8x512xf32, #tpu.memory_space<vmem>>, vector<8x512xf32>
    %1 = arith.truncf %0 : vector<8x512xf32> to vector<8x512xbf16>
    %c0_1 = arith.constant 0 : index
    %c0_2 = arith.constant 0 : index
    %2 = vector.load %arg2[%c0_1, %c0_2] : memref<512x512xbf16, #tpu.memory_space<vmem>>, vector<512x512xbf16>
    %cst = arith.constant dense<0.000000e+00> : vector<8x512xf32>
    %3 = tpu.matmul %1, %2, %cst {dimension_numbers = #tpu.dot_dimension_numbers<[1], [0], [0], [1], [0, 0, 1, 1], [], []>} : vector<8x512xbf16>, vector<512x512xbf16>, vector<8x512xf32> -> vector<8x512xf32>
    %c0_3 = arith.constant 0 : index
    %c0_4 = arith.constant 0 : index
    %4 = vector.load %arg3[%c0_3, %c0_4] : memref<1x512xf32, #tpu.memory_space<vmem>>, vector<1x512xf32>
    %5 = vector.broadcast %4 : vector<1x512xf32> to vector<8x512xf32>
    %6 = arith.addf %3, %5 : vector<8x512xf32>
    %cst_5 = arith.constant 0.000000e+00 : f32
    %7 = vector.broadcast %cst_5 : f32 to vector<8x512xf32>
    %8 = arith.maximumf %6, %7 : vector<8x512xf32>
    %9 = arith.truncf %8 : vector<8x512xf32> to vector<8x512xbf16>
    %c0_6 = arith.constant 0 : index
    %c0_7 = arith.constant 0 : index
    %10 = vector.load %arg4[%c0_6, %c0_7] : memref<512x512xbf16, #tpu.memory_space<vmem>>, vector<512x512xbf16>
    %cst_8 = arith.constant dense<0.000000e+00> : vector<8x512xf32>
    %11 = tpu.matmul %9, %10, %cst_8 {dimension_numbers = #tpu.dot_dimension_numbers<[1], [0], [0], [1], [0, 0, 1, 1], [], []>} : vector<8x512xbf16>, vector<512x512xbf16>, vector<8x512xf32> -> vector<8x512xf32>
    %c0_9 = arith.constant 0 : index
    %c0_10 = arith.constant 0 : index
    %12 = vector.load %arg5[%c0_9, %c0_10] : memref<1x512xf32, #tpu.memory_space<vmem>>, vector<1x512xf32>
    %13 = vector.broadcast %12 : vector<1x512xf32> to vector<8x512xf32>
    %14 = arith.addf %11, %13 : vector<8x512xf32>
    %cst_11 = arith.constant 0.000000e+00 : f32
    %15 = vector.broadcast %cst_11 : f32 to vector<8x512xf32>
    %16 = arith.maximumf %14, %15 : vector<8x512xf32>
    %17 = arith.truncf %16 : vector<8x512xf32> to vector<8x512xbf16>
    %c0_12 = arith.constant 0 : index
    %c0_13 = arith.constant 0 : index
    %18 = vector.load %arg6[%c0_12, %c0_13] : memref<512x128xbf16, #tpu.memory_space<vmem>>, vector<512x128xbf16>
    %cst_14 = arith.constant dense<0.000000e+00> : vector<8x128xf32>
    %19 = tpu.matmul %17, %18, %cst_14 {dimension_numbers = #tpu.dot_dimension_numbers<[1], [0], [0], [1], [0, 0, 1, 1], [], []>} : vector<8x512xbf16>, vector<512x128xbf16>, vector<8x128xf32> -> vector<8x128xf32>
    %c0_15 = arith.constant 0 : index
    %c0_16 = arith.constant 0 : index
    %20 = vector.load %arg7[%c0_15, %c0_16] : memref<1x128xf32, #tpu.memory_space<vmem>>, vector<1x128xf32>
    %21 = vector.broadcast %20 : vector<1x128xf32> to vector<8x128xf32>
    %22 = arith.addf %19, %21 : vector<8x128xf32>
    %c0_17 = arith.constant 0 : index
    %c0_18 = arith.constant 0 : index
    %23 = vector.load %arg8[%c0_17, %c0_18] : memref<8x128xf32, #tpu.memory_space<vmem>>, vector<8x128xf32>
    tpu.vector_store %arg8[%c0_17, %c0_18], %22 {strides = array<i32>} : memref<8x128xf32, #tpu.memory_space<vmem>>, vector<8x128xf32>,
    return
  }
  func.func @transform_0(%arg0: i32) -> (i32, i32) {
    %c0_i32 = arith.constant 0 : i32
    %c0_i32_0 = arith.constant 0 : i32
    return %arg0, %c0_i32 : i32, i32
  }
  func.func @transform_1(%arg0: i32) -> (i32, i32) {
    %c0_i32 = arith.constant 0 : i32
    %c0_i32_0 = arith.constant 0 : i32
    %c0_i32_1 = arith.constant 0 : i32
    return %c0_i32, %c0_i32_0 : i32, i32
  }
  func.func @transform_2(%arg0: i32) -> (i32, i32) {
    %c0_i32 = arith.constant 0 : i32
    %c0_i32_0 = arith.constant 0 : i32
    %c0_i32_1 = arith.constant 0 : i32
    return %c0_i32, %c0_i32_0 : i32, i32
  }
  func.func @transform_3(%arg0: i32) -> (i32, i32) {
    %c0_i32 = arith.constant 0 : i32
    %c0_i32_0 = arith.constant 0 : i32
    %c0_i32_1 = arith.constant 0 : i32
    return %c0_i32, %c0_i32_0 : i32, i32
  }
  func.func @transform_4(%arg0: i32) -> (i32, i32) {
    %c0_i32 = arith.constant 0 : i32
    %c0_i32_0 = arith.constant 0 : i32
    %c0_i32_1 = arith.constant 0 : i32
    return %c0_i32, %c0_i32_0 : i32, i32
  }
  func.func @transform_5(%arg0: i32) -> (i32, i32) {
    %c0_i32 = arith.constant 0 : i32
    %c0_i32_0 = arith.constant 0 : i32
    %c0_i32_1 = arith.constant 0 : i32
    return %c0_i32, %c0_i32_0 : i32, i32
  }
  func.func @transform_6(%arg0: i32) -> (i32, i32) {
    %c0_i32 = arith.constant 0 : i32
    %c0_i32_0 = arith.constant 0 : i32
    %c0_i32_1 = arith.constant 0 : i32
    return %c0_i32, %c0_i32_0 : i32, i32
  }
  func.func @transform_7(%arg0: i32) -> (i32, i32) {
    %c0_i32 = arith.constant 0 : i32
    %c0_i32_0 = arith.constant 0 : i32
    return %arg0, %c0_i32 : i32, i32
  }
}

</mosaic_0001>

<bundles_post_ra>
// kernel: label_predictor.1
= control target key start
LH: loop header
LB: loop body
LE: loop exit
PB: predicated region body
PF: predicated region fallthrough
CT: control target
= control target key end

     0   :  { %12 = vsyncpa [#allocation3], 0  ;;  %s3429_s0 = inlined_call_operand.hbm [shape: f32[8,512], index: 0, kind: input, shape index: {}]   ;;  %s3430_s1 = inlined_call_operand.hbm [shape: bf16[512,512], index: 1, kind: input, shape index: {}]   ;;  %s3431_s2 = inlined_call_operand.vmem [shape: f32[1,512], index: 2, kind: input, shape index: {}]   ;;  %s3432_s3 = inlined_call_operand.hbm [shape: bf16[512,512], index: 3, kind: input, shape index: {}]   ;;  %s3433_s4 = inlined_call_operand.vmem [shape: f32[1,512], index: 4, kind: input, shape index: {}]   ;;  %s3434_s5 = inlined_call_operand.hbm [shape: bf16[512,128], index: 5, kind: input, shape index: {}]   ;;  %s3435_s6 = inlined_call_operand.vmem [shape: f32[1,128], index: 6, kind: input, shape index: {}]   ;;  %s3436_s7 = inlined_call_operand.hbm [shape: f32[8,128], index: 7, kind: output, shape index: {}]  }
   0x1   :  { %13 = vsyncpa [#allocation6], 0 }
   0x2   :  { %14 = vsyncpa [#allocation9], 0 }
   0x3   :  { %15 = vsyncpa [#allocation4], 0  ;;  %s3274_s24 = smov [#allocation5]   ;;  %s3156_s28 = scalar_lea.hbm %s3430_s1, 16384 }
   0x4   :  { %s31_s25 = sshll.u32 %s3274_s24, 4  ;;  %p3157_p0 = scmp.ne.s32.totalorder %s3430_s1, %s3156_s28  ;;  %s32_s25 = int_to_ptr.vmem [resolvable:$true] %s31_s25 }
   0x5   :  { %p3160_p1 = scmp.lt.u32.totalorder %s3156_s28, %s3430_s1 }
   0x7   :  { %p3162_p2 = pnand %p3160_p1, %p3157_p0 }
   0x9   :  { %3165 = shalt.err (!%p3162_p2)
}
   0xa   :  { %s3166_s10 = scalar_lea.vmem %s32_s25, 16384  ;;  %p3171_p4 = scmp.lt.s32.totalorder %s32_s25, %s32_s25 }
   0xb   :  { %p3167_p3 = scmp.ne.s32.totalorder %s32_s25, %s3166_s10  ;;  %p3172_p5 = scmp.lt.s32.totalorder %s3166_s10, %s3166_s10 }
   0xd   :  { %p3173_p6 = por %p3172_p5, %p3171_p4 }
   0xf   :  { %p3174_p7 = pnand %p3173_p6, %p3167_p3 }
  0x11   :  { %3177 = shalt.err (!%p3174_p7)
}
  0x12   :  { %s3275_s11 = smov 256   ;;  %s3276_s12 = smov 16  }
  0x13   :  { %37 = dma.hbm_to_vmem [thread:$0]  %s3430_s1, 16384, %s32_s25, [#allocation6], %s3275_s11, %s3275_s11, %s3276_s12  }
  0x14   :  { %s3277_s15 = smov [#allocation2]   ;;  %s3278_s17 = smov [#allocation7]  }
  0x15   :  { %s22_s16 = sshll.u32 %s3277_s15, 4  ;;  %s45_s18 = sshll.u32 %s3278_s17, 4  ;;  %s23_s16 = int_to_ptr.vmem [resolvable:$true] %s22_s16  ;;  %s46_s18 = int_to_ptr.vmem [resolvable:$true] %s45_s18 }
  0x16   :  { %s3178_s21 = scalar_lea.hbm %s3429_s0, 512 }
  0x17   :  { %p3179_p8 = scmp.ne.s32.totalorder %s3429_s0, %s3178_s21  ;;  %p3182_p9 = scmp.lt.u32.totalorder %s3178_s21, %s3429_s0 }
  0x19   :  { %p3184_p10 = pnand %p3182_p9, %p3179_p8 }
  0x1b   :  { %3187 = shalt.err (!%p3184_p10)
}
  0x1c   :  { %s3188_s1 = scalar_lea.vmem %s23_s16, 512  ;;  %p3193_p12 = scmp.lt.s32.totalorder %s23_s16, %s23_s16 }
  0x1d   :  { %p3189_p11 = scmp.ne.s32.totalorder %s23_s16, %s3188_s1  ;;  %p3194_p13 = scmp.lt.s32.totalorder %s3188_s1, %s3188_s1 }
  0x1f   :  { %p3195_p0 = por %p3194_p13, %p3193_p12 }
  0x21   :  { %p3196_p1 = pnand %p3195_p0, %p3189_p11 }
  0x23   :  { %3199 = shalt.err (!%p3196_p1)
}
  0x24   :  { %25 = dma.hbm_to_vmem [thread:$0]  %s3429_s0, 512, %s23_s16, [#allocation3]  }
  0x25   :  { %s3200_s30 = scalar_lea.hbm %s3432_s3, 16384 }
  0x26   :  { %p3201_p2 = scmp.ne.s32.totalorder %s3432_s3, %s3200_s30  ;;  %p3204_p3 = scmp.lt.u32.totalorder %s3200_s30, %s3432_s3 }
  0x28   :  { %p3206_p4 = pnand %p3204_p3, %p3201_p2 }
  0x2a   :  { %3209 = shalt.err (!%p3206_p4)
}
  0x2b   :  { %s3210_s14 = scalar_lea.vmem %s46_s18, 16384  ;;  %p3215_p6 = scmp.lt.s32.totalorder %s46_s18, %s46_s18 }
  0x2c   :  { %p3211_p5 = scmp.ne.s32.totalorder %s46_s18, %s3210_s14  ;;  %p3216_p7 = scmp.lt.s32.totalorder %s3210_s14, %s3210_s14 }
  0x2e   :  { %p3217_p8 = por %p3216_p7, %p3215_p6 }
  0x30   :  { %p3218_p9 = pnand %p3217_p8, %p3211_p5 }
  0x32   :  { %3221 = shalt.err (!%p3218_p9)
}
  0x33   :  { %51 = dma.hbm_to_vmem [thread:$0]  %s3432_s3, 16384, %s46_s18, [#allocation6], %s3275_s11, %s3275_s11, %s3276_s12  }
  0x34   :  { %s3279_s16 = smov [#allocation8]   ;;  %s3222_s21 = scalar_lea.hbm %s3434_s5, 4096 }
  0x35   :  { %s59_s17 = sshll.u32 %s3279_s16, 4  ;;  %p3223_p10 = scmp.ne.s32.totalorder %s3434_s5, %s3222_s21  ;;  %s60_s17 = int_to_ptr.vmem [resolvable:$true] %s59_s17 }
  0x36   :  { %p3226_p11 = scmp.lt.u32.totalorder %s3222_s21, %s3434_s5 }
  0x38   :  { %p3228_p12 = pnand %p3226_p11, %p3223_p10 }
  0x3a   :  { %3231 = shalt.err (!%p3228_p12)
}
  0x3b   :  { %s3232_s1 = scalar_lea.vmem %s60_s17, 4096  ;;  %p3237_p0 = scmp.lt.s32.totalorder %s60_s17, %s60_s17 }
  0x3c   :  { %p3233_p13 = scmp.ne.s32.totalorder %s60_s17, %s3232_s1  ;;  %p3238_p1 = scmp.lt.s32.totalorder %s3232_s1, %s3232_s1 }
  0x3e   :  { %p3239_p2 = por %p3238_p1, %p3237_p0 }
  0x40   :  { %p3240_p3 = pnand %p3239_p2, %p3233_p13 }
  0x42   :  { %3243 = shalt.err (!%p3240_p3)
}
  0x43   :  { %s3280_s3 = smov 64   ;;  %s3281_s11 = smov 4  }
  0x44   :  { %65 = dma.hbm_to_vmem [thread:$0]  %s3434_s5, 4096, %s60_s17, [#allocation9], %s3280_s3, %s3280_s3, %s3281_s11  }
  0x45   :  { %3266 = dma.done.wait [#allocation3], 512  }
  0x46   :  { %3267 = vsyncadd [#allocation3], 4294966784 }
  0x47   :  { %3268 = dma.done.wait [#allocation6], 32768  }
  0x48   :  { %3269 = vsyncadd [#allocation6], 4294934528 }
  0x49   :  { %3270 = dma.done.wait [#allocation9], 4096  }
  0x4a   :  { %3271 = vsyncadd [#allocation9], 4294963200  ;;  %v2740_v0 = vld [vmem:[#allocation5 + $0x4] ss:$16 sps:$4 sm:$0xff]   ;;  %v2742_v1 = vld [vmem:[#allocation5 + $0xc] ss:$16 sps:$4 sm:$0xff]  }
  0x4b   :  { %879 = vmatprep.subr.bf16.mxu0 %v2740_v0  ;;  %v2744_v2 = vld [vmem:[#allocation5] ss:$16 sps:$4 sm:$0xff]   ;;  %v2745_v3 = vld [vmem:[#allocation5 + $0x8] ss:$16 sps:$4 sm:$0xff]   ;;  %961 = vmatprep.subr.bf16.mxu1 %v2742_v1  ;;  %v2746_v4 = vld [vmem:[#allocation5 + $0x24] ss:$16 sps:$4 sm:$0xff]  }
  0x4c   :  { %880 = vmatpush1.bf16.msra.mxu0 %v2744_v2  ;;  %962 = vmatpush1.bf16.msra.mxu1 %v2745_v3  ;;  %v2748_v5 = vld [vmem:[#allocation5 + $0x2c] ss:$16 sps:$4 sm:$0xff]   ;;  %v2750_v6 = vld [vmem:[#allocation5 + $0x20] ss:$16 sps:$4 sm:$0xff]   ;;  %v2751_v7 = vld [vmem:[#allocation5 + $0x28] ss:$16 sps:$4 sm:$0xff]  }
  0x4d   :  { %881 = vmatprep.subr.bf16.mxu0 %v2746_v4  ;;  %963 = vmatprep.subr.bf16.mxu1 %v2748_v5  ;;  %v2752_v8 = vld [vmem:[#allocation5 + $0x44] ss:$16 sps:$4 sm:$0xff]   ;;  %v2754_v9 = vld [vmem:[#allocation5 + $0x4c] ss:$16 sps:$4 sm:$0xff]   ;;  %v2756_v10 = vld [vmem:[#allocation5 + $0x40] ss:$16 sps:$4 sm:$0xff]  }
  0x4e   :  { %v2757_v11 = vld [vmem:[#allocation5 + $0x48] ss:$16 sps:$4 sm:$0xff]   ;;  %v2758_v12 = vld [vmem:[#allocation5 + $0x64] ss:$16 sps:$4 sm:$0xff]   ;;  %v2760_v13 = vld [vmem:[#allocation5 + $0x6c] ss:$16 sps:$4 sm:$0xff]  }
  0x4f   :  { %v2762_v14 = vld [vmem:[#allocation5 + $0x60] ss:$16 sps:$4 sm:$0xff]   ;;  %v2763_v15 = vld [vmem:[#allocation5 + $0x68] ss:$16 sps:$4 sm:$0xff]   ;;  %v2764_v16 = vld [vmem:[#allocation5 + $0x84] ss:$16 sps:$4 sm:$0xff]  }
  0x50   :  { %882 = vmatpush1.bf16.msra.mxu0 %v2750_v6  ;;  %964 = vmatpush1.bf16.msra.mxu1 %v2751_v7  ;;  %v2766_v17 = vld [vmem:[#allocation5 + $0x8c] ss:$16 sps:$4 sm:$0xff]   ;;  %v2768_v18 = vld [vmem:[#allocation5 + $0x80] ss:$16 sps:$4 sm:$0xff]   ;;  %v2769_v19 = vld [vmem:[#allocation5 + $0x88] ss:$16 sps:$4 sm:$0xff]  }
  0x51   :  { %883 = vmatprep.subr.bf16.mxu0 %v2752_v8  ;;  %965 = vmatprep.subr.bf16.mxu1 %v2754_v9  ;;  %v2770_v20 = vld [vmem:[#allocation5 + $0xa4] ss:$16 sps:$4 sm:$0xff]   ;;  %v2772_v21 = vld [vmem:[#allocation5 + $0xac] ss:$16 sps:$4 sm:$0xff]   ;;  %v2774_v22 = vld [vmem:[#allocation5 + $0xa0] ss:$16 sps:$4 sm:$0xff]  }
  0x52   :  { %v2775_v23 = vld [vmem:[#allocation5 + $0xa8] ss:$16 sps:$4 sm:$0xff]   ;;  %v2776_v24 = vld [vmem:[#allocation5 + $0xc4] ss:$16 sps:$4 sm:$0xff]   ;;  %v2778_v25 = vld [vmem:[#allocation5 + $0xcc] ss:$16 sps:$4 sm:$0xff]  }
  0x53   :  { %v2780_v26 = vld [vmem:[#allocation5 + $0xc0] ss:$16 sps:$4 sm:$0xff]   ;;  %v2781_v27 = vld [vmem:[#allocation5 + $0xc8] ss:$16 sps:$4 sm:$0xff]   ;;  %v2782_v28 = vld [vmem:[#allocation5 + $0xe4] ss:$16 sps:$4 sm:$0xff]  }
  0x54   :  { %884 = vmatpush1.bf16.msra.mxu0 %v2756_v10  ;;  %966 = vmatpush1.bf16.msra.mxu1 %v2757_v11  ;;  %v2784_v29 = vld [vmem:[#allocation5 + $0xec] ss:$16 sps:$4 sm:$0xff]   ;;  %v2786_v30 = vld [vmem:[#allocation5 + $0xe0] ss:$16 sps:$4 sm:$0xff]   ;;  %v2787_v31 = vld [vmem:[#allocation5 + $0xe8] ss:$16 sps:$4 sm:$0xff]  }
  0x55   :  { %885 = vmatprep.subr.bf16.mxu0 %v2758_v12  ;;  %967 = vmatprep.subr.bf16.mxu1 %v2760_v13  ;;  %v2788_v32 = vld [vmem:[#allocation5 + $0x104] ss:$16 sps:$4 sm:$0xff]   ;;  %v2790_v33 = vld [vmem:[#allocation5 + $0x10c] ss:$16 sps:$4 sm:$0xff]   ;;  %v2792_v34 = vld [vmem:[#allocation5 + $0x100] ss:$16 sps:$4 sm:$0xff]  }
  0x56   :  { %v2793_v35 = vld [vmem:[#allocation5 + $0x108] ss:$16 sps:$4 sm:$0xff]   ;;  %v2794_v36 = vld [vmem:[#allocation5 + $0x124] ss:$16 sps:$4 sm:$0xff]   ;;  %v2796_v37 = vld [vmem:[#allocation5 + $0x12c] ss:$16 sps:$4 sm:$0xff]  }
  0x57   :  { %v2798_v38 = vld [vmem:[#allocation5 + $0x120] ss:$16 sps:$4 sm:$0xff]   ;;  %v2799_v39 = vld [vmem:[#allocation5 + $0x128] ss:$16 sps:$4 sm:$0xff]   ;;  %v2800_v40 = vld [vmem:[#allocation5 + $0x144] ss:$16 sps:$4 sm:$0xff]  }
  0x58   :  { %886 = vmatpush1.bf16.msra.mxu0 %v2762_v14  ;;  %968 = vmatpush1.bf16.msra.mxu1 %v2763_v15  ;;  %v2802_v41 = vld [vmem:[#allocation5 + $0x14c] ss:$16 sps:$4 sm:$0xff]   ;;  %v2804_v42 = vld [vmem:[#allocation5 + $0x140] ss:$16 sps:$4 sm:$0xff]   ;;  %v2805_v43 = vld [vmem:[#allocation5 + $0x148] ss:$16 sps:$4 sm:$0xff]  }
  0x59   :  { %887 = vmatprep.subr.bf16.mxu0 %v2764_v16  ;;  %969 = vmatprep.subr.bf16.mxu1 %v2766_v17  ;;  %v2806_v44 = vld [vmem:[#allocation5 + $0x164] ss:$16 sps:$4 sm:$0xff]   ;;  %v2808_v45 = vld [vmem:[#allocation5 + $0x16c] ss:$16 sps:$4 sm:$0xff]   ;;  %v2810_v47 = vld [vmem:[#allocation5 + $0x160] ss:$16 sps:$4 sm:$0xff]  }
  0x5a   :  { %v82_v46 = vld [vmem:[#allocation2 + $0x8] sm:$0xff]  ;;  %v2812_v50 = vld [vmem:[#allocation5 + $0x184] ss:$16 sps:$4 sm:$0xff]   ;;  %v2816_v52 = vld [vmem:[#allocation5 + $0x180] ss:$16 sps:$4 sm:$0xff]   ;;  %s3282_s29 = smov [#allocation10]  }
  0x5b   :  { %v86_v48 = vpack.c.bf16 %v82_v46, %v82_v46  ;;  %v2811_v49 = vld [vmem:[#allocation5 + $0x168] ss:$16 sps:$4 sm:$0xff]   ;;  %v2814_v51 = vld [vmem:[#allocation5 + $0x18c] ss:$16 sps:$4 sm:$0xff]   ;;  %v2818_v54 = vld [vmem:[#allocation5 + $0x1a4] ss:$16 sps:$4 sm:$0xff]  }
  0x5c   :  { %888 = vmatpush1.bf16.msra.mxu0 %v2768_v18  ;;  %970 = vmatpush1.bf16.msra.mxu1 %v2769_v19  ;;  %v2817_v53 = vld [vmem:[#allocation5 + $0x188] ss:$16 sps:$4 sm:$0xff]   ;;  %v2820_v55 = vld [vmem:[#allocation5 + $0x1ac] ss:$16 sps:$4 sm:$0xff]   ;;  %v2822_v56 = vld [vmem:[#allocation5 + $0x1a0] ss:$16 sps:$4 sm:$0xff]  }
  0x5d   :  { %889 = vmatprep.subr.bf16.mxu0 %v2770_v20  ;;  %971 = vmatprep.subr.bf16.mxu1 %v2772_v21  ;;  %v2823_v57 = vld [vmem:[#allocation5 + $0x1a8] ss:$16 sps:$4 sm:$0xff]   ;;  %v2824_v58 = vld [vmem:[#allocation5 + $0x1c4] ss:$16 sps:$4 sm:$0xff]   ;;  %v2826_v59 = vld [vmem:[#allocation5 + $0x1cc] ss:$16 sps:$4 sm:$0xff]  }
  0x5e   :  { %911 = vmatprep.mubr.bf16.mxu0 %v86_v48  ;;  %993 = vmatprep.mubr.bf16.mxu1 %v86_v48  ;;  %v2828_v60 = vld [vmem:[#allocation5 + $0x1c0] ss:$16 sps:$4 sm:$0xff]   ;;  %v2829_v61 = vld [vmem:[#allocation5 + $0x1c8] ss:$16 sps:$4 sm:$0xff]   ;;  %v2830_v62 = vld [vmem:[#allocation5 + $0x1e4] ss:$16 sps:$4 sm:$0xff]  }
  0x5f   :  { %v2832_v63 = vld [vmem:[#allocation5 + $0x1ec] ss:$16 sps:$4 sm:$0xff]   ;;  %v2834_v0 = vld [vmem:[#allocation5 + $0x1e0] ss:$16 sps:$4 sm:$0xff]   ;;  %v2835_v1 = vld [vmem:[#allocation5 + $0x1e8] ss:$16 sps:$4 sm:$0xff]  }
  0x60   :  { %890 = vmatpush1.bf16.msra.mxu0 %v2774_v22  ;;  %972 = vmatpush1.bf16.msra.mxu1 %v2775_v23  ;;  %v81_v2 = vld [vmem:[#allocation2] sm:$0xff]  ;;  %v2841_v4 = vld [vmem:[#allocation5 + $0x20c] ss:$16 sps:$4 sm:$0xff]   ;;  %v2839_v7 = vld [vmem:[#allocation5 + $0x208] ss:$16 sps:$4 sm:$0xff]   ;;  %s2363_s30 = sshll.u32 %s3282_s29, 4  ;;  %s2364_s30 = int_to_ptr.vmem [resolvable:$true] %s2363_s30 }
  0x61   :  { %891 = vmatprep.subr.bf16.mxu0 %v2776_v24  ;;  %973 = vmatprep.subr.bf16.mxu1 %v2778_v25  ;;  %v2838_v3 = vld [vmem:[#allocation5 + $0x204] ss:$16 sps:$4 sm:$0xff]   ;;  %v85_v5 = vpack.c.bf16 %v81_v2, %v81_v2  ;;  %v2836_v6 = vld [vmem:[#allocation5 + $0x200] ss:$16 sps:$4 sm:$0xff]   ;;  %v2847_v9 = vld [vmem:[#allocation5 + $0x22c] ss:$16 sps:$4 sm:$0xff]   ;;  %p3249_p5 = scmp.lt.s32.totalorder %s2364_s30, %s2364_s30 }
  0x62   :  { %v2844_v8 = vld [vmem:[#allocation5 + $0x224] ss:$16 sps:$4 sm:$0xff]   ;;  %v2842_v10 = vld [vmem:[#allocation5 + $0x220] ss:$16 sps:$4 sm:$0xff]   ;;  %v2845_v11 = vld [vmem:[#allocation5 + $0x228] ss:$16 sps:$4 sm:$0xff]  }
  0x63   :  { %v2850_v12 = vld [vmem:[#allocation5 + $0x244] ss:$16 sps:$4 sm:$0xff]   ;;  %v2853_v13 = vld [vmem:[#allocation5 + $0x24c] ss:$16 sps:$4 sm:$0xff]   ;;  %v2848_v14 = vld [vmem:[#allocation5 + $0x240] ss:$16 sps:$4 sm:$0xff]  }
  0x64   :  { %892 = vmatpush1.bf16.msra.mxu0 %v2780_v26  ;;  %974 = vmatpush1.bf16.msra.mxu1 %v2781_v27  ;;  %v2851_v15 = vld [vmem:[#allocation5 + $0x248] ss:$16 sps:$4 sm:$0xff]   ;;  %v2856_v16 = vld [vmem:[#allocation5 + $0x264] ss:$16 sps:$4 sm:$0xff]   ;;  %v2859_v17 = vld [vmem:[#allocation5 + $0x26c] ss:$16 sps:$4 sm:$0xff]  }
  0x65   :  { %893 = vmatprep.subr.bf16.mxu0 %v2782_v28  ;;  %975 = vmatprep.subr.bf16.mxu1 %v2784_v29  ;;  %v2854_v18 = vld [vmem:[#allocation5 + $0x260] ss:$16 sps:$4 sm:$0xff]   ;;  %v2857_v19 = vld [vmem:[#allocation5 + $0x268] ss:$16 sps:$4 sm:$0xff]   ;;  %v2862_v20 = vld [vmem:[#allocation5 + $0x284] ss:$16 sps:$4 sm:$0xff]  }
  0x66   :  { %v2865_v21 = vld [vmem:[#allocation5 + $0x28c] ss:$16 sps:$4 sm:$0xff]   ;;  %v2860_v22 = vld [vmem:[#allocation5 + $0x280] ss:$16 sps:$4 sm:$0xff]   ;;  %v2863_v23 = vld [vmem:[#allocation5 + $0x288] ss:$16 sps:$4 sm:$0xff]  }
  0x67   :  { %v2868_v24 = vld [vmem:[#allocation5 + $0x2a4] ss:$16 sps:$4 sm:$0xff]   ;;  %v2871_v25 = vld [vmem:[#allocation5 + $0x2ac] ss:$16 sps:$4 sm:$0xff]   ;;  %v2866_v26 = vld [vmem:[#allocation5 + $0x2a0] ss:$16 sps:$4 sm:$0xff]  }
  0x68   :  { %894 = vmatpush1.bf16.msra.mxu0 %v2786_v30  ;;  %976 = vmatpush1.bf16.msra.mxu1 %v2787_v31  ;;  %v2869_v27 = vld [vmem:[#allocation5 + $0x2a8] ss:$16 sps:$4 sm:$0xff]   ;;  %v2874_v28 = vld [vmem:[#allocation5 + $0x2c4] ss:$16 sps:$4 sm:$0xff]   ;;  %v2877_v29 = vld [vmem:[#allocation5 + $0x2cc] ss:$16 sps:$4 sm:$0xff]  }
  0x69   :  { %895 = vmatprep.subr.bf16.mxu0 %v2788_v32  ;;  %977 = vmatprep.subr.bf16.mxu1 %v2790_v33  ;;  %v84_v30 = vld [vmem:[#allocation2 + $0x18] sm:$0xff]  ;;  %v2872_v31 = vld [vmem:[#allocation5 + $0x2c0] ss:$16 sps:$4 sm:$0xff]   ;;  %v2898_v46 = vld [vmem:[#allocation5 + $0x344] ss:$16 sps:$4 sm:$0xff]   ;;  %s3244_s8 = scalar_lea.vmem %s2364_s30, 128 }
  0x6a   :  { %v2875_v32 = vld [vmem:[#allocation5 + $0x2c8] ss:$16 sps:$4 sm:$0xff]   ;;  %v88_v33 = vpack.c.bf16 %v84_v30, %v84_v30  ;;  %v2896_v48 = vld [vmem:[#allocation5 + $0x340] ss:$16 sps:$4 sm:$0xff]   ;;  %v2928_v2 = vld [vmem:[#allocation5 + $0x3e4] ss:$16 sps:$4 sm:$0xff]   ;;  %p3245_p4 = scmp.ne.s32.totalorder %s2364_s30, %s3244_s8  ;;  %p3250_p6 = scmp.lt.s32.totalorder %s3244_s8, %s3244_s8 }
  0x6b   :  { %v2962_v30 = vld [vmem:[#allocation7 + $0xa0] ss:$16 sps:$4 sm:$0xff]  }
  0x6c   :  { %896 = vmatpush1.bf16.msra.mxu0 %v2792_v34  ;;  %978 = vmatpush1.bf16.msra.mxu1 %v2793_v35  ;;  %v2880_v34 = vld [vmem:[#allocation5 + $0x2e4] ss:$16 sps:$4 sm:$0xff]   ;;  %v2883_v35 = vld [vmem:[#allocation5 + $0x2ec] ss:$16 sps:$4 sm:$0xff]   ;;  %p3251_p7 = por %p3250_p6, %p3249_p5 }
  0x6d   :  { %897 = vmatprep.subr.bf16.mxu0 %v2794_v36  ;;  %979 = vmatprep.subr.bf16.mxu1 %v2796_v37  ;;  %v2878_v36 = vld [vmem:[#allocation5 + $0x2e0] ss:$16 sps:$4 sm:$0xff]   ;;  %v2881_v37 = vld [vmem:[#allocation5 + $0x2e8] ss:$16 sps:$4 sm:$0xff]  }
  0x6e   :  { %p3252_p8 = pnand %p3251_p7, %p3245_p4 }
  0x70   :  { %898 = vmatpush1.bf16.msra.mxu0 %v2798_v38  ;;  %980 = vmatpush1.bf16.msra.mxu1 %v2799_v39  ;;  %v2886_v38 = vld [vmem:[#allocation5 + $0x304] ss:$16 sps:$4 sm:$0xff]   ;;  %v2889_v39 = vld [vmem:[#allocation5 + $0x30c] ss:$16 sps:$4 sm:$0xff]  }
  0x71   :  { %899 = vmatprep.subr.bf16.mxu0 %v2800_v40  ;;  %981 = vmatprep.subr.bf16.mxu1 %v2802_v41  ;;  %v2884_v40 = vld [vmem:[#allocation5 + $0x300] ss:$16 sps:$4 sm:$0xff]   ;;  %v2887_v41 = vld [vmem:[#allocation5 + $0x308] ss:$16 sps:$4 sm:$0xff]  }
  0x74   :  { %900 = vmatpush1.bf16.msra.mxu0 %v2804_v42  ;;  %982 = vmatpush1.bf16.msra.mxu1 %v2805_v43  ;;  %v2892_v42 = vld [vmem:[#allocation5 + $0x324] ss:$16 sps:$4 sm:$0xff]   ;;  %v2895_v43 = vld [vmem:[#allocation5 + $0x32c] ss:$16 sps:$4 sm:$0xff]  }
  0x75   :  { %901 = vmatprep.subr.bf16.mxu0 %v2806_v44  ;;  %983 = vmatprep.subr.bf16.mxu1 %v2808_v45  ;;  %v2890_v44 = vld [vmem:[#allocation5 + $0x320] ss:$16 sps:$4 sm:$0xff]   ;;  %v2893_v45 = vld [vmem:[#allocation5 + $0x328] ss:$16 sps:$4 sm:$0xff]  }
  0x78   :  { %902 = vmatpush1.bf16.msra.mxu0 %v2810_v47  ;;  %984 = vmatpush1.bf16.msra.mxu1 %v2811_v49  ;;  %v2901_v47 = vld [vmem:[#allocation5 + $0x34c] ss:$16 sps:$4 sm:$0xff]   ;;  %v2899_v49 = vld [vmem:[#allocation5 + $0x348] ss:$16 sps:$4 sm:$0xff]  }
  0x79   :  { %903 = vmatprep.subr.bf16.mxu0 %v2812_v50  ;;  %985 = vmatprep.subr.bf16.mxu1 %v2814_v51  ;;  %v2904_v50 = vld [vmem:[#allocation5 + $0x364] ss:$16 sps:$4 sm:$0xff]   ;;  %v2907_v51 = vld [vmem:[#allocation5 + $0x36c] ss:$16 sps:$4 sm:$0xff]  }
  0x7c   :  { %904 = vmatpush1.bf16.msra.mxu0 %v2816_v52  ;;  %986 = vmatpush1.bf16.msra.mxu1 %v2817_v53  ;;  %v2902_v52 = vld [vmem:[#allocation5 + $0x360] ss:$16 sps:$4 sm:$0xff]   ;;  %v2905_v53 = vld [vmem:[#allocation5 + $0x368] ss:$16 sps:$4 sm:$0xff]  }
  0x7d   :  { %905 = vmatprep.subr.bf16.mxu0 %v2818_v54  ;;  %987 = vmatprep.subr.bf16.mxu1 %v2820_v55  ;;  %v2910_v54 = vld [vmem:[#allocation5 + $0x384] ss:$16 sps:$4 sm:$0xff]   ;;  %v2913_v55 = vld [vmem:[#allocation5 + $0x38c] ss:$16 sps:$4 sm:$0xff]  }
  0x80   :  { %906 = vmatpush1.bf16.msra.mxu0 %v2822_v56  ;;  %988 = vmatpush1.bf16.msra.mxu1 %v2823_v57  ;;  %v2908_v56 = vld [vmem:[#allocation5 + $0x380] ss:$16 sps:$4 sm:$0xff]   ;;  %v2911_v57 = vld [vmem:[#allocation5 + $0x388] ss:$16 sps:$4 sm:$0xff]  }
  0x81   :  { %907 = vmatprep.subr.bf16.mxu0 %v2824_v58  ;;  %989 = vmatprep.subr.bf16.mxu1 %v2826_v59  ;;  %v2916_v58 = vld [vmem:[#allocation5 + $0x3a4] ss:$16 sps:$4 sm:$0xff]   ;;  %v2919_v59 = vld [vmem:[#allocation5 + $0x3ac] ss:$16 sps:$4 sm:$0xff]  }
  0x84   :  { %908 = vmatpush1.bf16.msra.mxu0 %v2828_v60  ;;  %990 = vmatpush1.bf16.msra.mxu1 %v2829_v61  ;;  %v2914_v60 = vld [vmem:[#allocation5 + $0x3a0] ss:$16 sps:$4 sm:$0xff]   ;;  %v2917_v61 = vld [vmem:[#allocation5 + $0x3a8] ss:$16 sps:$4 sm:$0xff]  }
  0x85   :  { %909 = vmatprep.subr.bf16.mxu0 %v2830_v62  ;;  %991 = vmatprep.subr.bf16.mxu1 %v2832_v63  ;;  %v2922_v62 = vld [vmem:[#allocation5 + $0x3c4] ss:$16 sps:$4 sm:$0xff]   ;;  %v2925_v63 = vld [vmem:[#allocation5 + $0x3cc] ss:$16 sps:$4 sm:$0xff]  }
  0x88   :  { %910 = vmatpush1.bf16.msra.mxu0 %v2834_v0  ;;  %992 = vmatpush1.bf16.msra.mxu1 %v2835_v1  ;;  %v2920_v0 = vld [vmem:[#allocation5 + $0x3c0] ss:$16 sps:$4 sm:$0xff]   ;;  %v2923_v1 = vld [vmem:[#allocation5 + $0x3c8] ss:$16 sps:$4 sm:$0xff]  }
  0x89   :  { %920 = vmatprep.subr.bf16.mxu0 %v2838_v3  ;;  %1002 = vmatprep.subr.bf16.mxu1 %v2841_v4  ;;  %v2931_v3 = vld [vmem:[#allocation5 + $0x3ec] ss:$16 sps:$4 sm:$0xff]   ;;  %v2926_v4 = vld [vmem:[#allocation5 + $0x3e0] ss:$16 sps:$4 sm:$0xff]  }
  0x8b   :  { %912 = vmatmul.mubr.bf16.vlgmr.msra.gmra.mrb[0].mxu0 %v85_v5  ;;  %994 = vmatmul.mubr.bf16.vlgmr.msra.gmra.mrb[0].mxu1 %v85_v5  ;;  %v2929_v5 = vld [vmem:[#allocation5 + $0x3e8] ss:$16 sps:$4 sm:$0xff]  }
  0x8c   :  { %921 = vmatpush1.bf16.msra.mxu0 %v2836_v6  ;;  %1003 = vmatpush1.bf16.msra.mxu1 %v2839_v7  ;;  %v83_v6 = vld [vmem:[#allocation2 + $0x10] sm:$0xff] }
  0x8d   :  { %922 = vmatprep.subr.bf16.mxu0 %v2844_v8  ;;  %1004 = vmatprep.subr.bf16.mxu1 %v2847_v9  ;;  %v2934_v7 = vld [vmem:[#allocation7 + $0x4] ss:$16 sps:$4 sm:$0xff]   ;;  %v2937_v8 = vld [vmem:[#allocation7 + $0xc] ss:$16 sps:$4 sm:$0xff]   ;;  %v2932_v9 = vld [vmem:[#allocation7] ss:$16 sps:$4 sm:$0xff]  }
  0x8e   :  { %952 = vmatprep.mubr.bf16.mxu0 %v88_v33  ;;  %1034 = vmatprep.mubr.bf16.mxu1 %v88_v33  ;;  %v2973_v33 = vld [vmem:[#allocation7 + $0xcc] ss:$16 sps:$4 sm:$0xff]  }
  0x90   :  { %923 = vmatpush1.bf16.msra.mxu0 %v2842_v10  ;;  %1005 = vmatpush1.bf16.msra.mxu1 %v2845_v11  ;;  %v2935_v10 = vld [vmem:[#allocation7 + $0x8] ss:$16 sps:$4 sm:$0xff]   ;;  %v87_v11 = vpack.c.bf16 %v83_v6, %v83_v6  ;;  %v3022_v6 = vld [vmem:[#allocation7 + $0x1e0] ss:$16 sps:$4 sm:$0xff]  }
  0x91   :  { %924 = vmatprep.subr.bf16.mxu0 %v2850_v12  ;;  %1006 = vmatprep.subr.bf16.mxu1 %v2853_v13  ;;  %v2940_v12 = vld [vmem:[#allocation7 + $0x24] ss:$16 sps:$4 sm:$0xff]   ;;  %v2943_v13 = vld [vmem:[#allocation7 + $0x2c] ss:$16 sps:$4 sm:$0xff]  }
  0x94   :  { %925 = vmatpush1.bf16.msra.mxu0 %v2848_v14  ;;  %1007 = vmatpush1.bf16.msra.mxu1 %v2851_v15  ;;  %v2938_v14 = vld [vmem:[#allocation7 + $0x20] ss:$16 sps:$4 sm:$0xff]   ;;  %v2941_v15 = vld [vmem:[#allocation7 + $0x28] ss:$16 sps:$4 sm:$0xff]  }
  0x95   :  { %926 = vmatprep.subr.bf16.mxu0 %v2856_v16  ;;  %1008 = vmatprep.subr.bf16.mxu1 %v2859_v17  ;;  %v2946_v16 = vld [vmem:[#allocation7 + $0x44] ss:$16 sps:$4 sm:$0xff]   ;;  %v2949_v17 = vld [vmem:[#allocation7 + $0x4c] ss:$16 sps:$4 sm:$0xff]  }
  0x98   :  { %927 = vmatpush1.bf16.msra.mxu0 %v2854_v18  ;;  %1009 = vmatpush1.bf16.msra.mxu1 %v2857_v19  ;;  %v2944_v18 = vld [vmem:[#allocation7 + $0x40] ss:$16 sps:$4 sm:$0xff]   ;;  %v2947_v19 = vld [vmem:[#allocation7 + $0x48] ss:$16 sps:$4 sm:$0xff]  }
  0x99   :  { %928 = vmatprep.subr.bf16.mxu0 %v2862_v20  ;;  %1010 = vmatprep.subr.bf16.mxu1 %v2865_v21  ;;  %v2952_v20 = vld [vmem:[#allocation7 + $0x64] ss:$16 sps:$4 sm:$0xff]   ;;  %v2955_v21 = vld [vmem:[#allocation7 + $0x6c] ss:$16 sps:$4 sm:$0xff]  }
  0x9c   :  { %929 = vmatpush1.bf16.msra.mxu0 %v2860_v22  ;;  %1011 = vmatpush1.bf16.msra.mxu1 %v2863_v23  ;;  %v2950_v22 = vld [vmem:[#allocation7 + $0x60] ss:$16 sps:$4 sm:$0xff]   ;;  %v2953_v23 = vld [vmem:[#allocation7 + $0x68] ss:$16 sps:$4 sm:$0xff]  }
  0x9d   :  { %930 = vmatprep.subr.bf16.mxu0 %v2868_v24  ;;  %1012 = vmatprep.subr.bf16.mxu1 %v2871_v25  ;;  %v2958_v24 = vld [vmem:[#allocation7 + $0x84] ss:$16 sps:$4 sm:$0xff]   ;;  %v2961_v25 = vld [vmem:[#allocation7 + $0x8c] ss:$16 sps:$4 sm:$0xff]  }
  0xa0   :  { %931 = vmatpush1.bf16.msra.mxu0 %v2866_v26  ;;  %1013 = vmatpush1.bf16.msra.mxu1 %v2869_v27  ;;  %v2956_v26 = vld [vmem:[#allocation7 + $0x80] ss:$16 sps:$4 sm:$0xff]   ;;  %v2959_v27 = vld [vmem:[#allocation7 + $0x88] ss:$16 sps:$4 sm:$0xff]  }
  0xa1   :  { %932 = vmatprep.subr.bf16.mxu0 %v2874_v28  ;;  %1014 = vmatprep.subr.bf16.mxu1 %v2877_v29  ;;  %v2964_v28 = vld [vmem:[#allocation7 + $0xa4] ss:$16 sps:$4 sm:$0xff]   ;;  %v2967_v29 = vld [vmem:[#allocation7 + $0xac] ss:$16 sps:$4 sm:$0xff]  }
  0xa4   :  { %933 = vmatpush1.bf16.msra.mxu0 %v2872_v31  ;;  %1015 = vmatpush1.bf16.msra.mxu1 %v2875_v32  ;;  %v2965_v31 = vld [vmem:[#allocation7 + $0xa8] ss:$16 sps:$4 sm:$0xff]   ;;  %v2970_v32 = vld [vmem:[#allocation7 + $0xc4] ss:$16 sps:$4 sm:$0xff]  }
  0xa5   :  { %934 = vmatprep.subr.bf16.mxu0 %v2880_v34  ;;  %1016 = vmatprep.subr.bf16.mxu1 %v2883_v35  ;;  %v2968_v34 = vld [vmem:[#allocation7 + $0xc0] ss:$16 sps:$4 sm:$0xff]   ;;  %v2971_v35 = vld [vmem:[#allocation7 + $0xc8] ss:$16 sps:$4 sm:$0xff]  }
  0xa8   :  { %935 = vmatpush1.bf16.msra.mxu0 %v2878_v36  ;;  %1017 = vmatpush1.bf16.msra.mxu1 %v2881_v37  ;;  %v2976_v36 = vld [vmem:[#allocation7 + $0xe4] ss:$16 sps:$4 sm:$0xff]   ;;  %v2979_v37 = vld [vmem:[#allocation7 + $0xec] ss:$16 sps:$4 sm:$0xff]  }
  0xa9   :  { %936 = vmatprep.subr.bf16.mxu0 %v2886_v38  ;;  %1018 = vmatprep.subr.bf16.mxu1 %v2889_v39  ;;  %v2974_v38 = vld [vmem:[#allocation7 + $0xe0] ss:$16 sps:$4 sm:$0xff]   ;;  %v2977_v39 = vld [vmem:[#allocation7 + $0xe8] ss:$16 sps:$4 sm:$0xff]  }
  0xac   :  { %937 = vmatpush1.bf16.msra.mxu0 %v2884_v40  ;;  %1019 = vmatpush1.bf16.msra.mxu1 %v2887_v41  ;;  %v2982_v40 = vld [vmem:[#allocation7 + $0x104] ss:$16 sps:$4 sm:$0xff]   ;;  %v2985_v41 = vld [vmem:[#allocation7 + $0x10c] ss:$16 sps:$4 sm:$0xff]  }
  0xad   :  { %938 = vmatprep.subr.bf16.mxu0 %v2892_v42  ;;  %1020 = vmatprep.subr.bf16.mxu1 %v2895_v43  ;;  %v2980_v42 = vld [vmem:[#allocation7 + $0x100] ss:$16 sps:$4 sm:$0xff]   ;;  %v2983_v43 = vld [vmem:[#allocation7 + $0x108] ss:$16 sps:$4 sm:$0xff]  }
  0xb0   :  { %939 = vmatpush1.bf16.msra.mxu0 %v2890_v44  ;;  %1021 = vmatpush1.bf16.msra.mxu1 %v2893_v45  ;;  %v2988_v44 = vld [vmem:[#allocation7 + $0x124] ss:$16 sps:$4 sm:$0xff]   ;;  %v2991_v45 = vld [vmem:[#allocation7 + $0x12c] ss:$16 sps:$4 sm:$0xff]  }
  0xb1   :  { %940 = vmatprep.subr.bf16.mxu0 %v2898_v46  ;;  %1022 = vmatprep.subr.bf16.mxu1 %v2901_v47  ;;  %v2986_v46 = vld [vmem:[#allocation7 + $0x120] ss:$16 sps:$4 sm:$0xff]   ;;  %v2989_v47 = vld [vmem:[#allocation7 + $0x128] ss:$16 sps:$4 sm:$0xff]  }
  0xb4   :  { %941 = vmatpush1.bf16.msra.mxu0 %v2896_v48  ;;  %1023 = vmatpush1.bf16.msra.mxu1 %v2899_v49  ;;  %v2994_v48 = vld [vmem:[#allocation7 + $0x144] ss:$16 sps:$4 sm:$0xff]   ;;  %v2997_v49 = vld [vmem:[#allocation7 + $0x14c] ss:$16 sps:$4 sm:$0xff]  }
  0xb5   :  { %942 = vmatprep.subr.bf16.mxu0 %v2904_v50  ;;  %1024 = vmatprep.subr.bf16.mxu1 %v2907_v51  ;;  %v2992_v50 = vld [vmem:[#allocation7 + $0x140] ss:$16 sps:$4 sm:$0xff]   ;;  %v2995_v51 = vld [vmem:[#allocation7 + $0x148] ss:$16 sps:$4 sm:$0xff]  }
  0xb8   :  { %943 = vmatpush1.bf16.msra.mxu0 %v2902_v52  ;;  %1025 = vmatpush1.bf16.msra.mxu1 %v2905_v53  ;;  %v3000_v52 = vld [vmem:[#allocation7 + $0x164] ss:$16 sps:$4 sm:$0xff]   ;;  %v3003_v53 = vld [vmem:[#allocation7 + $0x16c] ss:$16 sps:$4 sm:$0xff]  }
  0xb9   :  { %944 = vmatprep.subr.bf16.mxu0 %v2910_v54  ;;  %1026 = vmatprep.subr.bf16.mxu1 %v2913_v55  ;;  %v2998_v54 = vld [vmem:[#allocation7 + $0x160] ss:$16 sps:$4 sm:$0xff]   ;;  %v3001_v55 = vld [vmem:[#allocation7 + $0x168] ss:$16 sps:$4 sm:$0xff]  }
  0xbc   :  { %945 = vmatpush1.bf16.msra.mxu0 %v2908_v56  ;;  %1027 = vmatpush1.bf16.msra.mxu1 %v2911_v57  ;;  %v3006_v56 = vld [vmem:[#allocation7 + $0x184] ss:$16 sps:$4 sm:$0xff]   ;;  %v3009_v57 = vld [vmem:[#allocation7 + $0x18c] ss:$16 sps:$4 sm:$0xff]  }
  0xbd   :  { %946 = vmatprep.subr.bf16.mxu0 %v2916_v58  ;;  %1028 = vmatprep.subr.bf16.mxu1 %v2919_v59  ;;  %v3004_v58 = vld [vmem:[#allocation7 + $0x180] ss:$16 sps:$4 sm:$0xff]   ;;  %v3007_v59 = vld [vmem:[#allocation7 + $0x188] ss:$16 sps:$4 sm:$0xff]  }
  0xc0   :  { %947 = vmatpush1.bf16.msra.mxu0 %v2914_v60  ;;  %1029 = vmatpush1.bf16.msra.mxu1 %v2917_v61  ;;  %v3012_v60 = vld [vmem:[#allocation7 + $0x1a4] ss:$16 sps:$4 sm:$0xff]   ;;  %v3015_v61 = vld [vmem:[#allocation7 + $0x1ac] ss:$16 sps:$4 sm:$0xff]  }
  0xc1   :  { %948 = vmatprep.subr.bf16.mxu0 %v2922_v62  ;;  %1030 = vmatprep.subr.bf16.mxu1 %v2925_v63  ;;  %v3010_v62 = vld [vmem:[#allocation7 + $0x1a0] ss:$16 sps:$4 sm:$0xff]   ;;  %v3013_v63 = vld [vmem:[#allocation7 + $0x1a8] ss:$16 sps:$4 sm:$0xff]  }
  0xc4   :  { %949 = vmatpush1.bf16.msra.mxu0 %v2920_v0  ;;  %1031 = vmatpush1.bf16.msra.mxu1 %v2923_v1  ;;  %v3018_v0 = vld [vmem:[#allocation7 + $0x1c4] ss:$16 sps:$4 sm:$0xff]   ;;  %v3021_v1 = vld [vmem:[#allocation7 + $0x1cc] ss:$16 sps:$4 sm:$0xff]  }
  0xc5   :  { %950 = vmatprep.subr.bf16.mxu0 %v2928_v2  ;;  %1032 = vmatprep.subr.bf16.mxu1 %v2931_v3  ;;  %v3016_v2 = vld [vmem:[#allocation7 + $0x1c0] ss:$16 sps:$4 sm:$0xff]   ;;  %v3019_v3 = vld [vmem:[#allocation7 + $0x1c8] ss:$16 sps:$4 sm:$0xff]  }
  0xc8   :  { %951 = vmatpush1.bf16.msra.mxu0 %v2926_v4  ;;  %1033 = vmatpush1.bf16.msra.mxu1 %v2929_v5  ;;  %v3024_v4 = vld [vmem:[#allocation7 + $0x1e4] ss:$16 sps:$4 sm:$0xff]   ;;  %v3027_v5 = vld [vmem:[#allocation7 + $0x1ec] ss:$16 sps:$4 sm:$0xff]  }
  0xc9   :  { %1841 = vmatprep.subr.bf16.mxu0 %v2934_v7  ;;  %1923 = vmatprep.subr.bf16.mxu1 %v2937_v8  ;;  %v3025_v7 = vld [vmem:[#allocation7 + $0x1e8] ss:$16 sps:$4 sm:$0xff]   ;;  %v3030_v8 = vld [vmem:[#allocation7 + $0x204] ss:$16 sps:$4 sm:$0xff]  }
  0xcb   :  { %953 = vmatmul.mubr.bf16.vlgmr.msra.gmra.mrb[0].mxu0 %v87_v11  ;;  %1035 = vmatmul.mubr.bf16.vlgmr.msra.gmra.mrb[0].mxu1 %v87_v11 }
  0xcc   :  { %1842 = vmatpush1.bf16.msra.mxu0 %v2932_v9  ;;  %1924 = vmatpush1.bf16.msra.mxu1 %v2935_v10  ;;  %v3033_v9 = vld [vmem:[#allocation7 + $0x20c] ss:$16 sps:$4 sm:$0xff]   ;;  %v219_v10 = vlaneseq }
  0xcd   :  { %1843 = vmatprep.subr.bf16.mxu0 %v2940_v12  ;;  %1925 = vmatprep.subr.bf16.mxu1 %v2943_v13  ;;  %v3383_v13 = vld [vmem:[%s3431_s2] sm:$0xf] }
  0xce   :  { %v3377_v11 = vshrl.u32 %v219_v10, 7  ;;  %v3090_v10 = vld [vmem:[#allocation7 + $0x344] ss:$16 sps:$4 sm:$0xff]  }
  0xd0   :  { %1844 = vmatpush1.bf16.msra.mxu0 %v2938_v14  ;;  %1926 = vmatpush1.bf16.msra.mxu1 %v2941_v15  ;;  %v221_v12 = vsub.s32 0, %v3377_v11  ;;  %v225_v14 = vsub.s32 1, %v3377_v11  ;;  %v233_v15 = vsub.s32 3, %v3377_v11 }
  0xd1   :  { %1845 = vmatprep.subr.bf16.mxu0 %v2946_v16  ;;  %1927 = vmatprep.subr.bf16.mxu1 %v2949_v17 }
  0xd2   :  { %v222_v16 = vrot.slane %v3383_v13, %v221_v12  ;;  %v226_v17 = vrot.slane %v3383_v13, %v225_v14 }
  0xd4   :  { %1846 = vmatpush1.bf16.msra.mxu0 %v2944_v18  ;;  %1928 = vmatpush1.bf16.msra.mxu1 %v2947_v19  ;;  %v234_v18 = vrot.slane %v3383_v13, %v233_v15 }
  0xd5   :  { %1847 = vmatprep.subr.bf16.mxu0 %v2952_v20  ;;  %1929 = vmatprep.subr.bf16.mxu1 %v2955_v21 }
  0xd8   :  { %1848 = vmatpush1.bf16.msra.mxu0 %v2950_v22  ;;  %1930 = vmatpush1.bf16.msra.mxu1 %v2953_v23 }
  0xd9   :  { %1849 = vmatprep.subr.bf16.mxu0 %v2958_v24  ;;  %1931 = vmatprep.subr.bf16.mxu1 %v2961_v25 }
  0xdc   :  { %1850 = vmatpush1.bf16.msra.mxu0 %v2956_v26  ;;  %1932 = vmatpush1.bf16.msra.mxu1 %v2959_v27 }
  0xdd   :  { %1851 = vmatprep.subr.bf16.mxu0 %v2964_v28  ;;  %1933 = vmatprep.subr.bf16.mxu1 %v2967_v29 }
  0xe0   :  { %1852 = vmatpush1.bf16.msra.mxu0 %v2962_v30  ;;  %1934 = vmatpush1.bf16.msra.mxu1 %v2965_v31 }
  0xe1   :  { %1853 = vmatprep.subr.bf16.mxu0 %v2970_v32  ;;  %1935 = vmatprep.subr.bf16.mxu1 %v2973_v33 }
  0xe4   :  { %1854 = vmatpush1.bf16.msra.mxu0 %v2968_v34  ;;  %1936 = vmatpush1.bf16.msra.mxu1 %v2971_v35  ;;  %v3028_v34 = vld [vmem:[#allocation7 + $0x200] ss:$16 sps:$4 sm:$0xff]   ;;  %v3031_v35 = vld [vmem:[#allocation7 + $0x208] ss:$16 sps:$4 sm:$0xff]  }
  0xe5   :  { %1855 = vmatprep.subr.bf16.mxu0 %v2976_v36  ;;  %1937 = vmatprep.subr.bf16.mxu1 %v2979_v37  ;;  %v3036_v37 = vld [vmem:[#allocation7 + $0x224] ss:$16 sps:$4 sm:$0xff]  }
  0xe8   :  { %1856 = vmatpush1.bf16.msra.mxu0 %v2974_v38  ;;  %1938 = vmatpush1.bf16.msra.mxu1 %v2977_v39  ;;  %v3039_v38 = vld [vmem:[#allocation7 + $0x22c] ss:$16 sps:$4 sm:$0xff]  }
  0xe9   :  { %1857 = vmatprep.subr.bf16.mxu0 %v2982_v40  ;;  %1939 = vmatprep.subr.bf16.mxu1 %v2985_v41  ;;  %v3034_v40 = vld [vmem:[#allocation7 + $0x220] ss:$16 sps:$4 sm:$0xff]   ;;  %v3037_v41 = vld [vmem:[#allocation7 + $0x228] ss:$16 sps:$4 sm:$0xff]  }
  0xec   :  { %1858 = vmatpush1.bf16.msra.mxu0 %v2980_v42  ;;  %1940 = vmatpush1.bf16.msra.mxu1 %v2983_v43  ;;  %v3042_v42 = vld [vmem:[#allocation7 + $0x244] ss:$16 sps:$4 sm:$0xff]   ;;  %v3045_v43 = vld [vmem:[#allocation7 + $0x24c] ss:$16 sps:$4 sm:$0xff]  }
  0xed   :  { %1859 = vmatprep.subr.bf16.mxu0 %v2988_v44  ;;  %1941 = vmatprep.subr.bf16.mxu1 %v2991_v45  ;;  %v3040_v44 = vld [vmem:[#allocation7 + $0x240] ss:$16 sps:$4 sm:$0xff]   ;;  %v3043_v45 = vld [vmem:[#allocation7 + $0x248] ss:$16 sps:$4 sm:$0xff]  }
  0xf0   :  { %1860 = vmatpush1.bf16.msra.mxu0 %v2986_v46  ;;  %1942 = vmatpush1.bf16.msra.mxu1 %v2989_v47  ;;  %v3048_v46 = vld [vmem:[#allocation7 + $0x264] ss:$16 sps:$4 sm:$0xff]   ;;  %v3051_v47 = vld [vmem:[#allocation7 + $0x26c] ss:$16 sps:$4 sm:$0xff]  }
  0xf1   :  { %1861 = vmatprep.subr.bf16.mxu0 %v2994_v48  ;;  %1943 = vmatprep.subr.bf16.mxu1 %v2997_v49  ;;  %v3046_v48 = vld [vmem:[#allocation7 + $0x260] ss:$16 sps:$4 sm:$0xff]   ;;  %v3049_v49 = vld [vmem:[#allocation7 + $0x268] ss:$16 sps:$4 sm:$0xff]  }
  0xf4   :  { %1862 = vmatpush1.bf16.msra.mxu0 %v2992_v50  ;;  %1944 = vmatpush1.bf16.msra.mxu1 %v2995_v51  ;;  %v3054_v50 = vld [vmem:[#allocation7 + $0x284] ss:$16 sps:$4 sm:$0xff]   ;;  %v3057_v51 = vld [vmem:[#allocation7 + $0x28c] ss:$16 sps:$4 sm:$0xff]  }
  0xf5   :  { %1863 = vmatprep.subr.bf16.mxu0 %v3000_v52  ;;  %1945 = vmatprep.subr.bf16.mxu1 %v3003_v53  ;;  %v3052_v52 = vld [vmem:[#allocation7 + $0x280] ss:$16 sps:$4 sm:$0xff]   ;;  %v3055_v53 = vld [vmem:[#allocation7 + $0x288] ss:$16 sps:$4 sm:$0xff]  }
  0xf8   :  { %1864 = vmatpush1.bf16.msra.mxu0 %v2998_v54  ;;  %1946 = vmatpush1.bf16.msra.mxu1 %v3001_v55  ;;  %v3060_v54 = vld [vmem:[#allocation7 + $0x2a4] ss:$16 sps:$4 sm:$0xff]   ;;  %v3063_v55 = vld [vmem:[#allocation7 + $0x2ac] ss:$16 sps:$4 sm:$0xff]  }
  0xf9   :  { %1865 = vmatprep.subr.bf16.mxu0 %v3006_v56  ;;  %1947 = vmatprep.subr.bf16.mxu1 %v3009_v57  ;;  %v3058_v56 = vld [vmem:[#allocation7 + $0x2a0] ss:$16 sps:$4 sm:$0xff]   ;;  %v3061_v57 = vld [vmem:[#allocation7 + $0x2a8] ss:$16 sps:$4 sm:$0xff]  }
  0xfc   :  { %1866 = vmatpush1.bf16.msra.mxu0 %v3004_v58  ;;  %1948 = vmatpush1.bf16.msra.mxu1 %v3007_v59  ;;  %v3066_v58 = vld [vmem:[#allocation7 + $0x2c4] ss:$16 sps:$4 sm:$0xff]   ;;  %v3069_v59 = vld [vmem:[#allocation7 + $0x2cc] ss:$16 sps:$4 sm:$0xff]  }
  0xfd   :  { %1867 = vmatprep.subr.bf16.mxu0 %v3012_v60  ;;  %1949 = vmatprep.subr.bf16.mxu1 %v3015_v61  ;;  %v3064_v60 = vld [vmem:[#allocation7 + $0x2c0] ss:$16 sps:$4 sm:$0xff]   ;;  %v3067_v61 = vld [vmem:[#allocation7 + $0x2c8] ss:$16 sps:$4 sm:$0xff]  }
 0x100   :  { %1868 = vmatpush1.bf16.msra.mxu0 %v3010_v62  ;;  %1950 = vmatpush1.bf16.msra.mxu1 %v3013_v63  ;;  %v3072_v62 = vld [vmem:[#allocation7 + $0x2e4] ss:$16 sps:$4 sm:$0xff]   ;;  %v3075_v63 = vld [vmem:[#allocation7 + $0x2ec] ss:$16 sps:$4 sm:$0xff]  }
 0x101   :  { %1869 = vmatprep.subr.bf16.mxu0 %v3018_v0  ;;  %1951 = vmatprep.subr.bf16.mxu1 %v3021_v1  ;;  %v3070_v0 = vld [vmem:[#allocation7 + $0x2e0] ss:$16 sps:$4 sm:$0xff]   ;;  %v3073_v1 = vld [vmem:[#allocation7 + $0x2e8] ss:$16 sps:$4 sm:$0xff]  }
 0x104   :  { %1870 = vmatpush1.bf16.msra.mxu0 %v3016_v2  ;;  %1952 = vmatpush1.bf16.msra.mxu1 %v3019_v3  ;;  %v3078_v2 = vld [vmem:[#allocation7 + $0x304] ss:$16 sps:$4 sm:$0xff]   ;;  %v3081_v3 = vld [vmem:[#allocation7 + $0x30c] ss:$16 sps:$4 sm:$0xff]  }
 0x105   :  { %1871 = vmatprep.subr.bf16.mxu0 %v3024_v4  ;;  %1953 = vmatprep.subr.bf16.mxu1 %v3027_v5  ;;  %v3076_v4 = vld [vmem:[#allocation7 + $0x300] ss:$16 sps:$4 sm:$0xff]   ;;  %v3079_v5 = vld [vmem:[#allocation7 + $0x308] ss:$16 sps:$4 sm:$0xff]  }
 0x108   :  { %1872 = vmatpush1.bf16.msra.mxu0 %v3022_v6  ;;  %1954 = vmatpush1.bf16.msra.mxu1 %v3025_v7  ;;  %v3084_v6 = vld [vmem:[#allocation7 + $0x324] ss:$16 sps:$4 sm:$0xff]   ;;  %v3087_v7 = vld [vmem:[#allocation7 + $0x32c] ss:$16 sps:$4 sm:$0xff]  }
 0x109   :  { %1882 = vmatprep.subr.bf16.mxu0 %v3030_v8  ;;  %1964 = vmatprep.subr.bf16.mxu1 %v3033_v9  ;;  %v3082_v8 = vld [vmem:[#allocation7 + $0x320] ss:$16 sps:$4 sm:$0xff]   ;;  %v3085_v9 = vld [vmem:[#allocation7 + $0x328] ss:$16 sps:$4 sm:$0xff]  }
 0x19e   :  { %v954_v19 = vpop.f32.mrb[0].mxu0  ;;  %v3396_v20 = vpop.f32.mrb[0].mxu1 }
 0x19f   :  { %v2707_v21 = vadd.f32 %v954_v19, %v222_v16  ;;  %v956_v22 = vpop.f32.mrb[1].mxu0  ;;  %v1038_v23 = vpop.f32.mrb[1].mxu1  ;;  %v3093_v16 = vld [vmem:[#allocation7 + $0x34c] ss:$16 sps:$4 sm:$0xff]   ;;  %v3096_v19 = vld [vmem:[#allocation7 + $0x364] ss:$16 sps:$4 sm:$0xff]  }
 0x1a0   :  { %v2708_v24 = vadd.f32 %v956_v22, %v226_v17  ;;  %v2710_v25 = vadd.f32 %v1038_v23, %v234_v18  ;;  %v958_v26 = vpop.f32.mrb[2].mxu0  ;;  %v1040_v27 = vpop.f32.mrb[2].mxu1  ;;  %v3088_v17 = vld [vmem:[#allocation7 + $0x340] ss:$16 sps:$4 sm:$0xff]   ;;  %v3091_v18 = vld [vmem:[#allocation7 + $0x348] ss:$16 sps:$4 sm:$0xff]  }
 0x1a1   :  { %v1043_v28 = vmax.f32 %v2707_v21, 0.0  ;;  %v959_v29 = vpop.f32.mrb[3].mxu0  ;;  %v1041_v30 = vpop.f32.mrb[3].mxu1  ;;  %v3099_v21 = vld [vmem:[#allocation7 + $0x36c] ss:$16 sps:$4 sm:$0xff]  }
 0x1a2   :  { %v1044_v31 = vmax.f32 %v2708_v24, 0.0  ;;  %v1046_v32 = vmax.f32 %v2710_v25, 0.0  ;;  %v3094_v22 = vld [vmem:[#allocation7 + $0x360] ss:$16 sps:$4 sm:$0xff]   ;;  %v3097_v23 = vld [vmem:[#allocation7 + $0x368] ss:$16 sps:$4 sm:$0xff]  }
 0x1a3   :  { %v1047_v36 = vpack.c.bf16 %v1043_v28, %v1043_v28  ;;  %v3102_v24 = vld [vmem:[#allocation7 + $0x384] ss:$16 sps:$4 sm:$0xff]   ;;  %v3105_v25 = vld [vmem:[#allocation7 + $0x38c] ss:$16 sps:$4 sm:$0xff]   ;;  %v3100_v26 = vld [vmem:[#allocation7 + $0x380] ss:$16 sps:$4 sm:$0xff]  }
 0x1a4   :  { %v1048_v33 = vpack.c.bf16 %v1044_v31, %v1044_v31  ;;  %v1050_v39 = vpack.c.bf16 %v1046_v32, %v1046_v32  ;;  %v3103_v27 = vld [vmem:[#allocation7 + $0x388] ss:$16 sps:$4 sm:$0xff]   ;;  %v229_v28 = vsub.s32 2, %v3377_v11  ;;  %v3108_v29 = vld [vmem:[#allocation7 + $0x3a4] ss:$16 sps:$4 sm:$0xff]  }
 0x1a5   :  { %v3111_v30 = vld [vmem:[#allocation7 + $0x3ac] ss:$16 sps:$4 sm:$0xff]   ;;  %v3106_v31 = vld [vmem:[#allocation7 + $0x3a0] ss:$16 sps:$4 sm:$0xff]   ;;  %v3109_v32 = vld [vmem:[#allocation7 + $0x3a8] ss:$16 sps:$4 sm:$0xff]  }
 0x1a6   :  { %1873 = vmatprep.mubr.bf16.mxu0 %v1048_v33  ;;  %1955 = vmatprep.mubr.bf16.mxu1 %v1048_v33  ;;  %v230_v33 = vrot.slane %v3383_v13, %v229_v28  ;;  %v3124_v13 = vld [vmem:[#allocation8 + $0x40] sm:$0xff]  }
 0x1a7   :  { %1874 = vmatmul.mubr.bf16.vlgmr.msra.gmra.mrb[4].mxu0 %v1047_v36  ;;  %1956 = vmatmul.mubr.bf16.vlgmr.msra.gmra.mrb[4].mxu1 %v1047_v36  ;;  %v3112_v36 = vld [vmem:[#allocation7 + $0x3c0] ss:$16 sps:$4 sm:$0xff]  }
 0x1a8   :  { %1883 = vmatpush1.bf16.msra.mxu0 %v3028_v34  ;;  %1965 = vmatpush1.bf16.msra.mxu1 %v3031_v35  ;;  %v3114_v34 = vld [vmem:[#allocation7 + $0x3c4] ss:$16 sps:$4 sm:$0xff]   ;;  %v3117_v35 = vld [vmem:[#allocation7 + $0x3cc] ss:$16 sps:$4 sm:$0xff]  }
 0x1a9   :  { %1914 = vmatprep.mubr.bf16.mxu0 %v1050_v39  ;;  %1996 = vmatprep.mubr.bf16.mxu1 %v1050_v39  ;;  %v3120_v39 = vld [vmem:[#allocation7 + $0x3e4] ss:$16 sps:$4 sm:$0xff]  }
 0x1aa   :  { %1884 = vmatprep.subr.bf16.mxu0 %v3036_v37  ;;  %1966 = vmatprep.subr.bf16.mxu1 %v3039_v38  ;;  %v3115_v37 = vld [vmem:[#allocation7 + $0x3c8] ss:$16 sps:$4 sm:$0xff]   ;;  %v2709_v38 = vadd.f32 %v3396_v20, %v230_v33 }
 0x1ab   :  { %v3128_v20 = vld [vmem:[#allocation8 + $0x48] sm:$0xff]  }
 0x1ac   :  { %1885 = vmatpush1.bf16.msra.mxu0 %v3034_v40  ;;  %1967 = vmatpush1.bf16.msra.mxu1 %v3037_v41  ;;  %v3123_v40 = vld [vmem:[#allocation7 + $0x3ec] ss:$16 sps:$4 sm:$0xff]   ;;  %v3118_v41 = vld [vmem:[#allocation7 + $0x3e0] ss:$16 sps:$4 sm:$0xff]  }
 0x1ad   :  { %1886 = vmatprep.subr.bf16.mxu0 %v3042_v42  ;;  %1968 = vmatprep.subr.bf16.mxu1 %v3045_v43  ;;  %v3121_v42 = vld [vmem:[#allocation7 + $0x3e8] ss:$16 sps:$4 sm:$0xff]   ;;  %v1045_v43 = vmax.f32 %v2709_v38, 0.0 }
 0x1b0   :  { %1887 = vmatpush1.bf16.msra.mxu0 %v3040_v44  ;;  %1969 = vmatpush1.bf16.msra.mxu1 %v3043_v45  ;;  %v3125_v44 = vld [vmem:[#allocation8 + $0xc0] sm:$0xff]  }
 0x1b1   :  { %1888 = vmatprep.subr.bf16.mxu0 %v3048_v46  ;;  %1970 = vmatprep.subr.bf16.mxu1 %v3051_v47  ;;  %v3126_v45 = vld [vmem:[#allocation8] sm:$0xff]   ;;  %v1049_v47 = vpack.c.bf16 %v1045_v43, %v1045_v43 }
 0x1b2   :  { %v3127_v46 = vld [vmem:[#allocation8 + $0x80] sm:$0xff]  }
 0x1b4   :  { %1889 = vmatpush1.bf16.msra.mxu0 %v3046_v48  ;;  %1971 = vmatpush1.bf16.msra.mxu1 %v3049_v49  ;;  %v3129_v48 = vld [vmem:[#allocation8 + $0xc8] sm:$0xff]  }
 0x1b5   :  { %1890 = vmatprep.subr.bf16.mxu0 %v3054_v50  ;;  %1972 = vmatprep.subr.bf16.mxu1 %v3057_v51  ;;  %v3130_v49 = vld [vmem:[#allocation8 + $0x8] sm:$0xff]   ;;  %v3132_v51 = vld [vmem:[#allocation8 + $0x50] sm:$0xff]  }
 0x1b6   :  { %v3131_v50 = vld [vmem:[#allocation8 + $0x88] sm:$0xff]  }
 0x1b8   :  { %1891 = vmatpush1.bf16.msra.mxu0 %v3052_v52  ;;  %1973 = vmatpush1.bf16.msra.mxu1 %v3055_v53  ;;  %v3133_v52 = vld [vmem:[#allocation8 + $0xd0] sm:$0xff]  }
 0x1b9   :  { %1892 = vmatprep.subr.bf16.mxu0 %v3060_v54  ;;  %1974 = vmatprep.subr.bf16.mxu1 %v3063_v55  ;;  %v3134_v53 = vld [vmem:[#allocation8 + $0x10] sm:$0xff]   ;;  %v3136_v55 = vld [vmem:[#allocation8 + $0x58] sm:$0xff]  }
 0x1ba   :  { %v3135_v54 = vld [vmem:[#allocation8 + $0x90] sm:$0xff]  }
 0x1bc   :  { %1893 = vmatpush1.bf16.msra.mxu0 %v3058_v56  ;;  %1975 = vmatpush1.bf16.msra.mxu1 %v3061_v57  ;;  %v3137_v56 = vld [vmem:[#allocation8 + $0xd8] sm:$0xff]  }
 0x1bd   :  { %1894 = vmatprep.subr.bf16.mxu0 %v3066_v58  ;;  %1976 = vmatprep.subr.bf16.mxu1 %v3069_v59  ;;  %v3138_v57 = vld [vmem:[#allocation8 + $0x18] sm:$0xff]   ;;  %v3140_v59 = vld [vmem:[#allocation8 + $0x60] sm:$0xff]  }
 0x1be   :  { %v3139_v58 = vld [vmem:[#allocation8 + $0x98] sm:$0xff]  }
 0x1c0   :  { %1895 = vmatpush1.bf16.msra.mxu0 %v3064_v60  ;;  %1977 = vmatpush1.bf16.msra.mxu1 %v3067_v61  ;;  %v3141_v60 = vld [vmem:[#allocation8 + $0xe0] sm:$0xff]  }
 0x1c1   :  { %1896 = vmatprep.subr.bf16.mxu0 %v3072_v62  ;;  %1978 = vmatprep.subr.bf16.mxu1 %v3075_v63  ;;  %v3142_v61 = vld [vmem:[#allocation8 + $0x20] sm:$0xff]   ;;  %v3144_v63 = vld [vmem:[#allocation8 + $0x68] sm:$0xff]  }
 0x1c2   :  { %v3143_v62 = vld [vmem:[#allocation8 + $0xa0] sm:$0xff]  }
 0x1c4   :  { %1897 = vmatpush1.bf16.msra.mxu0 %v3070_v0  ;;  %1979 = vmatpush1.bf16.msra.mxu1 %v3073_v1  ;;  %v3145_v0 = vld [vmem:[#allocation8 + $0xe8] sm:$0xff]  }
 0x1c5   :  { %1898 = vmatprep.subr.bf16.mxu0 %v3078_v2  ;;  %1980 = vmatprep.subr.bf16.mxu1 %v3081_v3  ;;  %v3146_v1 = vld [vmem:[#allocation8 + $0x28] sm:$0xff]   ;;  %v3148_v3 = vld [vmem:[#allocation8 + $0x70] sm:$0xff]  }
 0x1c6   :  { %v3147_v2 = vld [vmem:[#allocation8 + $0xa8] sm:$0xff]  }
 0x1c8   :  { %1899 = vmatpush1.bf16.msra.mxu0 %v3076_v4  ;;  %1981 = vmatpush1.bf16.msra.mxu1 %v3079_v5  ;;  %v3149_v4 = vld [vmem:[#allocation8 + $0xf0] sm:$0xff]  }
 0x1c9   :  { %1900 = vmatprep.subr.bf16.mxu0 %v3084_v6  ;;  %1982 = vmatprep.subr.bf16.mxu1 %v3087_v7  ;;  %v3150_v5 = vld [vmem:[#allocation8 + $0x30] sm:$0xff]   ;;  %v3152_v7 = vld [vmem:[#allocation8 + $0x78] sm:$0xff]  }
 0x1ca   :  { %v3151_v6 = vld [vmem:[#allocation8 + $0xb0] sm:$0xff]  }
 0x1cc   :  { %1901 = vmatpush1.bf16.msra.mxu0 %v3082_v8  ;;  %1983 = vmatpush1.bf16.msra.mxu1 %v3085_v9  ;;  %v3153_v8 = vld [vmem:[#allocation8 + $0xf8] sm:$0xff]  }
 0x1cd   :  { %1902 = vmatprep.subr.bf16.mxu0 %v3090_v10  ;;  %1984 = vmatprep.subr.bf16.mxu1 %v3093_v16  ;;  %v3154_v9 = vld [vmem:[#allocation8 + $0x38] sm:$0xff]   ;;  %v1179_v16 = vld [vmem:[%s3433_s4] sm:$0xf] }
 0x1ce   :  { %v3155_v10 = vld [vmem:[#allocation8 + $0xb8] sm:$0xff]  }
 0x1d0   :  { %1903 = vmatpush1.bf16.msra.mxu0 %v3088_v17  ;;  %1985 = vmatpush1.bf16.msra.mxu1 %v3091_v18  ;;  %v1184_v17 = vrot.slane %v1179_v16, %v221_v12  ;;  %v1192_v18 = vrot.slane %v1179_v16, %v229_v28 }
 0x1d1   :  { %1904 = vmatprep.subr.bf16.mxu0 %v3096_v19  ;;  %1986 = vmatprep.subr.bf16.mxu1 %v3099_v21  ;;  %v1188_v19 = vrot.slane %v1179_v16, %v225_v14  ;;  %v1196_v21 = vrot.slane %v1179_v16, %v233_v15 }
 0x1d4   :  { %1905 = vmatpush1.bf16.msra.mxu0 %v3094_v22  ;;  %1987 = vmatpush1.bf16.msra.mxu1 %v3097_v23 }
 0x1d5   :  { %1906 = vmatprep.subr.bf16.mxu0 %v3102_v24  ;;  %1988 = vmatprep.subr.bf16.mxu1 %v3105_v25 }
 0x1d8   :  { %1907 = vmatpush1.bf16.msra.mxu0 %v3100_v26  ;;  %1989 = vmatpush1.bf16.msra.mxu1 %v3103_v27 }
 0x1d9   :  { %1908 = vmatprep.subr.bf16.mxu0 %v3108_v29  ;;  %1990 = vmatprep.subr.bf16.mxu1 %v3111_v30 }
 0x1dc   :  { %1909 = vmatpush1.bf16.msra.mxu0 %v3106_v31  ;;  %1991 = vmatpush1.bf16.msra.mxu1 %v3109_v32 }
 0x1dd   :  { %1910 = vmatprep.subr.bf16.mxu0 %v3114_v34  ;;  %1992 = vmatprep.subr.bf16.mxu1 %v3117_v35 }
 0x1e0   :  { %1911 = vmatpush1.bf16.msra.mxu0 %v3112_v36  ;;  %1993 = vmatpush1.bf16.msra.mxu1 %v3115_v37 }
 0x1e1   :  { %1912 = vmatprep.subr.bf16.mxu0 %v3120_v39  ;;  %1994 = vmatprep.subr.bf16.mxu1 %v3123_v40  ;;  %v2630_v40 = vld [vmem:[%s3435_s6] ss:$0 sm:$0xff] }
 0x1e4   :  { %1913 = vmatpush1.bf16.msra.mxu0 %v3118_v41  ;;  %1995 = vmatpush1.bf16.msra.mxu1 %v3121_v42 }
 0x1e5   :  { %2663 = vmatprep.subr.bf16.mxu0 %v3124_v13  ;;  %2685 = vmatprep.subr.bf16.mxu1 %v3125_v44 }
 0x1e7   :  { %1915 = vmatmul.mubr.bf16.vlgmr.msra.gmra.mrb[4].mxu0 %v1049_v47  ;;  %1997 = vmatmul.mubr.bf16.vlgmr.msra.gmra.mrb[4].mxu1 %v1049_v47 }
 0x1e8   :  { %2664 = vmatpush3.bf16.msra.mxu0 %v3126_v45  ;;  %2686 = vmatpush3.bf16.msra.mxu1 %v3127_v46 }
 0x1e9   :  { %2665 = vmatprep.subr.bf16.mxu0 %v3128_v20  ;;  %2687 = vmatprep.subr.bf16.mxu1 %v3129_v48 }
 0x1ec   :  { %2666 = vmatpush3.bf16.msra.mxu0 %v3130_v49  ;;  %2688 = vmatpush3.bf16.msra.mxu1 %v3131_v50 }
 0x1ed   :  { %2667 = vmatprep.subr.bf16.mxu0 %v3132_v51  ;;  %2689 = vmatprep.subr.bf16.mxu1 %v3133_v52 }
 0x1f0   :  { %2668 = vmatpush3.bf16.msra.mxu0 %v3134_v53  ;;  %2690 = vmatpush3.bf16.msra.mxu1 %v3135_v54 }
 0x1f1   :  { %2669 = vmatprep.subr.bf16.mxu0 %v3136_v55  ;;  %2691 = vmatprep.subr.bf16.mxu1 %v3137_v56 }
 0x1f4   :  { %2670 = vmatpush3.bf16.msra.mxu0 %v3138_v57  ;;  %2692 = vmatpush3.bf16.msra.mxu1 %v3139_v58 }
 0x1f5   :  { %2671 = vmatprep.subr.bf16.mxu0 %v3140_v59  ;;  %2693 = vmatprep.subr.bf16.mxu1 %v3141_v60 }
 0x1f8   :  { %2672 = vmatpush3.bf16.msra.mxu0 %v3142_v61  ;;  %2694 = vmatpush3.bf16.msra.mxu1 %v3143_v62 }
 0x1f9   :  { %2673 = vmatprep.subr.bf16.mxu0 %v3144_v63  ;;  %2695 = vmatprep.subr.bf16.mxu1 %v3145_v0 }
 0x1fc   :  { %2674 = vmatpush3.bf16.msra.mxu0 %v3146_v1  ;;  %2696 = vmatpush3.bf16.msra.mxu1 %v3147_v2 }
 0x1fd   :  { %2675 = vmatprep.subr.bf16.mxu0 %v3148_v3  ;;  %2697 = vmatprep.subr.bf16.mxu1 %v3149_v4 }
 0x200   :  { %2676 = vmatpush3.bf16.msra.mxu0 %v3150_v5  ;;  %2698 = vmatpush3.bf16.msra.mxu1 %v3151_v6 }
 0x201   :  { %2677 = vmatprep.subr.bf16.mxu0 %v3152_v7  ;;  %2699 = vmatprep.subr.bf16.mxu1 %v3153_v8 }
 0x204   :  { %2678 = vmatpush3.bf16.msra.mxu0 %v3154_v9  ;;  %2700 = vmatpush3.bf16.msra.mxu1 %v3155_v10 }
 0x2ba   :  { %v1916_v22 = vpop.f32.mrb[4].mxu0  ;;  %v1998_v23 = vpop.f32.mrb[4].mxu1 }
 0x2bb   :  { %v2711_v24 = vadd.f32 %v1916_v22, %v1184_v17  ;;  %v2713_v25 = vadd.f32 %v1998_v23, %v1192_v18  ;;  %v1918_v26 = vpop.f32.mrb[5].mxu0  ;;  %v2000_v27 = vpop.f32.mrb[5].mxu1 }
 0x2bc   :  { %v2712_v29 = vadd.f32 %v1918_v26, %v1188_v19  ;;  %v2714_v30 = vadd.f32 %v2000_v27, %v1196_v21  ;;  %v1920_v31 = vpop.f32.mrb[6].mxu0  ;;  %v2002_v32 = vpop.f32.mrb[6].mxu1 }
 0x2bd   :  { %v2005_v12 = vmax.f32 %v2711_v24, 0.0  ;;  %v2007_v33 = vmax.f32 %v2713_v25, 0.0  ;;  %v1921_v34 = vpop.f32.mrb[7].mxu0  ;;  %v2003_v28 = vpop.f32.mrb[7].mxu1 }
 0x2be   :  { %v2006_v35 = vmax.f32 %v2712_v29, 0.0  ;;  %v2008_v36 = vmax.f32 %v2714_v30, 0.0 }
 0x2bf   :  { %v2009_v11 = vpack.c.bf16 %v2005_v12, %v2005_v12  ;;  %v2011_v15 = vpack.c.bf16 %v2007_v33, %v2007_v33 }
 0x2c0   :  { %v2010_v14 = vpack.c.bf16 %v2006_v35, %v2006_v35  ;;  %v2012_v37 = vpack.c.bf16 %v2008_v36, %v2008_v36 }
 0x2c2   :  { %2308 = vmatprep.mubr.bf16.mxu0 %v2010_v14  ;;  %2348 = vmatprep.mubr.bf16.mxu1 %v2012_v37 }
 0x2c3   :  { %2309 = vmatmul.mubr.bf16.vlgmr.msra.gmra.mrb[8].mxu0 %v2009_v11  ;;  %2349 = vmatmul.mubr.bf16.vlgmr.msra.gmra.mrb[8].mxu1 %v2011_v15 }
 0x396   :  { %v2679_v38 = vpop.f32.mrb[8].mxu0  ;;  %v2701_v39 = vpop.f32.mrb[8].mxu1 }
 0x397   :  { %v2680_v41 = vpop.f32.mrb[9].mxu0  ;;  %v2702_v42 = vpop.f32.mrb[9].mxu1 }
 0x398   :  { %v2681_v43 = vadd.f32 %v2680_v41, %v2679_v38  ;;  %v2703_v13 = vadd.f32 %v2702_v42, %v2701_v39  ;;  %v2682_v44 = vpop.f32.mrb[10].mxu0  ;;  %v2704_v45 = vpop.f32.mrb[10].mxu1 }
 0x399   :  { %v2683_v46 = vpop.f32.mrb[11].mxu0  ;;  %v2705_v47 = vpop.f32.mrb[11].mxu1 }
 0x39a   :  { %v2311_v20 = vadd.f32 %v2681_v43, %v2630_v40 }
 0x39c   :  { %v2351_v48 = vadd.f32 %v2703_v13, %v2311_v20 }
 0x39e   :  { %2356 = vst [vmem:[#allocation10] sm:$0xff] %v2351_v48 }
 0x39f   :  { %3255 = shalt.err (!%p3252_p8)
}
 0x3a0   :  { %s3256_s10 = scalar_lea.hbm %s3436_s7, 128 }
 0x3a1   :  { %p3257_p9 = scmp.ne.s32.totalorder %s3436_s7, %s3256_s10  ;;  %p3260_p10 = scmp.lt.u32.totalorder %s3256_s10, %s3436_s7 }
 0x3a3   :  { %p3262_p11 = pnand %p3260_p10, %p3257_p9 }
 0x3a5   :  { %3265 = shalt.err (!%p3262_p11)
}
 0x3a6   :  { %2366 = dma.vmem_to_hbm [thread:$0]  %s2364_s30, 128, %s3436_s7, [#allocation4]  }
 0x3a7   :  { %3272 = dma.done.wait [#allocation4], 128  }
 0x3a8   :  { %3273 = vsyncadd [#allocation4], 4294967168 }
 0x3a9   :  { %2370 = vsyncpa [#allocation3], 1 }
 0x3aa   :  { %2371 = vsyncpa [#allocation6], 1 }
 0x3ab   :  { %2372 = vsyncpa [#allocation9], 1 }
 0x3ac   :  { %2373 = vsyncpa [#allocation4], 1 }

</bundles_post_ra>
